<compile_context>
chip_gen: v5e
topology: v5e:2x2
jax: 0.10.0
libtpu: 0.0.40
codegen_flags: <defaults>
</compile_context>

<pallas_src>
import math

import jax
import jax.numpy as jnp
from jax.experimental import pallas as pl
from jax.experimental.pallas import tpu as pltpu


def _round_up(a: int, b: int) -> int:
    return pl.cdiv(a, b) * b


# --------------------------------------------------------------------------- #
# Kernel: out_tile = x_tile @ theta_packed    (NN matmul, f32 accumulation)
# --------------------------------------------------------------------------- #
def _noise_matmul_kernel(x_ref, t_ref, o_ref):
    o_ref[...] = jnp.dot(
        x_ref[...], t_ref[...], preferred_element_type=jnp.float32
    ).astype(o_ref.dtype)


# --------------------------------------------------------------------------- #
# Wrapper
# --------------------------------------------------------------------------- #
def noise_adaptation(x, w, *, max_tile_rows=None):
    """x: (..., K), w: (K, K) nn.Linear weight.  Returns x @ softmax(w.T, axis=0)."""
    k = x.shape[-1]
    assert w.shape == (k, k)
    assert jnp.issubdtype(x.dtype, jnp.floating), "NoiseAdaptation expects float x"

    lead = x.shape[:-1]
    n = math.prod(lead) if lead else 1
    x2 = x.reshape(n, k)

    # theta = softmax(W^T, dim=0): tiny (k, k) op done in plain JAX so XLA fuses
    # it with the kron packing and dtype cast (review: no dedicated softmax kernel).
    theta = jax.nn.softmax(w.astype(jnp.float32).T, axis=0)

    # Lane-dense packing width: pk = pcopies * k_pad is a multiple of 128 so every
    # load/store in the kernel is full-lane (unmasked vst).
    if 128 % k == 0:
        k_pad = k
    elif k < 128:
        k_pad = pl.next_power_of_2(k)          # next divisor of 128
    else:
        k_pad = _round_up(k, 128)
    pcopies = max(1, 128 // k_pad)
    pk = pcopies * k_pad

    # Minimal padding: in the common case (n % (8*pcopies) == 0 and k | 128) there
    # is NO pad and NO output slice -> no extra HBM copies of x or out.
    pad_cols = k_pad - k
    n_pad = _round_up(n, 8 * pcopies)          # packed row count multiple of 8
    pad_rows = n_pad - n
    if pad_rows or pad_cols:
        x2 = jnp.pad(x2, ((0, pad_rows), (0, pad_cols)))
        if pad_cols:
            theta = jnp.pad(theta, ((0, pad_cols), (0, pad_cols)))
    r_pad = n_pad // pcopies
    xp = x2.reshape(r_pad, pk)                 # free row-major reshape

    # Block-diagonal replication of theta (one-time wrapper layout plumbing); it
    # is already in (contract-dim, out-dim) order -> plain NN matmul in the kernel.
    tbig = jnp.kron(jnp.eye(pcopies, dtype=theta.dtype), theta) if pcopies > 1 else theta
    # TODO(synk): for bf16 x this quantizes the softmax probabilities to bf16 (PyTorch keeps f32).
    tbig = tbig.astype(x.dtype)
    # TODO(synk): for very large k (resident (pk,pk) theta >~ 8 MiB, k >= ~1536 f32) the
    # contraction dimension should be tiled instead of keeping theta fully resident (v7x VMEM).

    # Adaptive row tile.
    itemsize = jnp.dtype(x.dtype).itemsize
    cap_rows = 16384 if itemsize <= 2 else 8192
    vmem_budget = 40 * 1024 * 1024
    theta_bytes = 2 * pk * pk * itemsize                       # double-buffered resident block
    max_by_vmem = max((vmem_budget - theta_bytes) // (4 * pk * itemsize), 8)
    max_by_vmem = (max_by_vmem // 8) * 8
    tile_r = max(512, _round_up(pl.cdiv(r_pad, 16), 8))        # >= ~16 steps when big
    tile_r = min(tile_r, cap_rows, max_by_vmem, r_pad)
    if max_tile_rows is not None:
        tile_r = min(tile_r, max(8, (max_tile_rows // 8) * 8))
    tile_r = max(tile_r, 8)
    grid = (pl.cdiv(r_pad, tile_r),)

    out_p = pl.pallas_call(
        _noise_matmul_kernel,
        out_shape=jax.ShapeDtypeStruct((r_pad, pk), x.dtype),
        grid=grid,
        in_specs=[
            pl.BlockSpec((tile_r, pk), lambda i: (i, 0)),      # x tile, pipelined over rows
            pl.BlockSpec((pk, pk), lambda i: (0, 0)),          # packed theta, resident
        ],
        out_specs=pl.BlockSpec((tile_r, pk), lambda i: (i, 0)),
        compiler_params=pltpu.CompilerParams(
            dimension_semantics=("parallel",),                 # megacore sharding
            vmem_limit_bytes=48 * 1024 * 1024,
        ),
        cost_estimate=pl.CostEstimate(
            flops=2 * r_pad * pk * pk,
            transcendentals=0,
            bytes_accessed=(2 * r_pad * pk + pk * pk) * itemsize,
        ),
    )(xp, tbig)

    out = out_p.reshape(n_pad, k_pad)
    if pad_rows or pad_cols:
        out = out[:n, :k]                                      # copies only when padded
    return out.reshape(*lead, k)


if __name__ == "__main__":
    key = jax.random.PRNGKey(0)
    na = jax.jit(noise_adaptation)

    # Case 1: module-sized example (k = 8 classes, batch = 16).
    kw, kx = jax.random.split(key)
    w8 = jax.random.normal(kw, (8, 8), dtype=jnp.float32)
    xa = jax.random.normal(kx, (16, 8), dtype=jnp.float32)
    oa = jax.block_until_ready(na(xa, w8))
    ra = xa @ jax.nn.softmax(w8.T, axis=0)
    assert oa.shape == xa.shape
    assert jnp.allclose(oa, ra, atol=1e-4, rtol=1e-4), "case 1 mismatch"

    # Case 2: 3-D leading dims; n = 4*32 = 128 is a multiple of 8*pcopies, so the
    # wrapper does no padding / slicing at all (pure 1-read + 1-write HBM traffic).
    xb = jax.random.normal(jax.random.PRNGKey(1), (4, 32, 8), dtype=jnp.float32)
    ob = jax.block_until_ready(na(xb, w8))
    rb = xb @ jax.nn.softmax(w8.T, axis=0)
    assert ob.shape == xb.shape
    assert jnp.allclose(ob, rb, atol=1e-4, rtol=1e-4), "case 2 mismatch"

    # Case 3: k = 10 (does not divide 128) exercises the lane-dense padding fallback.
    kw3, kx3 = jax.random.split(jax.random.PRNGKey(2))
    w10 = jax.random.normal(kw3, (10, 10), dtype=jnp.float32)
    xc = jax.random.normal(kx3, (16, 10), dtype=jnp.float32)
    oc = jax.block_until_ready(na(xc, w10))
    rc = xc @ jax.nn.softmax(w10.T, axis=0)
    assert oc.shape == xc.shape
    assert jnp.allclose(oc, rc, atol=1e-4, rtol=1e-4), "case 3 mismatch"

    print("KERNEL_OK")
</pallas_src>

<mosaic_0001>
module attributes {stable_mosaic.version = 11 : i64} {
  func.func @_noise_matmul_kernel(%arg0: i32, %arg1: memref<8x128xf32, #tpu.memory_space<vmem>>, %arg2: memref<128x128xf32, #tpu.memory_space<vmem>>, %arg3: memref<8x128xf32, #tpu.memory_space<vmem>>) attributes {dimension_semantics = [#tpu.dimension_semantics<parallel>], iteration_bounds = array<i64: 1>, scalar_prefetch = 0 : i64, scratch_operands = 0 : i64, tpu.core_type = #tpu.core_type<tc>, window_params = [{transform_indices = @transform_0, window_bounds = array<i64: 8, 128>}, {pipeline_mode = #tpu.pipeline_mode<synchronous>, transform_indices = @transform_1, window_bounds = array<i64: 128, 128>}, {transform_indices = @transform_2, window_bounds = array<i64: 8, 128>}]} {
    %c0 = arith.constant 0 : index
    %c0_0 = arith.constant 0 : index
    %0 = vector.load %arg1[%c0, %c0_0] : memref<8x128xf32, #tpu.memory_space<vmem>>, vector<8x128xf32>
    %c0_1 = arith.constant 0 : index
    %c0_2 = arith.constant 0 : index
    %1 = vector.load %arg2[%c0_1, %c0_2] : memref<128x128xf32, #tpu.memory_space<vmem>>, vector<128x128xf32>
    %cst = arith.constant dense<0.000000e+00> : vector<8x128xf32>
    %2 = tpu.matmul %0, %1, %cst {dimension_numbers = #tpu.dot_dimension_numbers<[1], [0], [0], [1], [0, 0, 1, 1], [], []>} : vector<8x128xf32>, vector<128x128xf32>, vector<8x128xf32> -> vector<8x128xf32>
    %c0_3 = arith.constant 0 : index
    %c0_4 = arith.constant 0 : index
    %3 = vector.load %arg3[%c0_3, %c0_4] : memref<8x128xf32, #tpu.memory_space<vmem>>, vector<8x128xf32>
    tpu.vector_store %arg3[%c0_3, %c0_4], %2 {strides = array<i32>} : memref<8x128xf32, #tpu.memory_space<vmem>>, vector<8x128xf32>,
    return
  }
  func.func @transform_0(%arg0: i32) -> (i32, i32) {
    %c0_i32 = arith.constant 0 : i32
    %c0_i32_0 = arith.constant 0 : i32
    return %arg0, %c0_i32 : i32, i32
  }
  func.func @transform_1(%arg0: i32) -> (i32, i32) {
    %c0_i32 = arith.constant 0 : i32
    %c0_i32_0 = arith.constant 0 : i32
    %c0_i32_1 = arith.constant 0 : i32
    return %c0_i32, %c0_i32_0 : i32, i32
  }
  func.func @transform_2(%arg0: i32) -> (i32, i32) {
    %c0_i32 = arith.constant 0 : i32
    %c0_i32_0 = arith.constant 0 : i32
    return %arg0, %c0_i32 : i32, i32
  }
}

</mosaic_0001>

<bundles_post_ra>
// kernel: noise_adaptation.1
= control target key start
LH: loop header
LB: loop body
LE: loop exit
PB: predicated region body
PF: predicated region fallthrough
CT: control target
= control target key end

     0   :  { %s122_s1 = inlined_call_operand.vmem [shape: f32[128,128], index: 1, kind: input, shape index: {}]   ;;  %s123_s0 = inlined_call_operand.vmem [shape: f32[8,128], index: 0, kind: input, shape index: {}]   ;;  %s124_s2 = inlined_call_operand.vmem [shape: f32[8,128], index: 2, kind: output, shape index: {}]  }
   0x1   :  { %v27_v0 = vld [vmem:[%s122_s1 + $0x78] sm:$0xff]  ;;  %v26_v1 = vld [vmem:[%s122_s1 + $0x70] sm:$0xff]  ;;  %v25_v2 = vld [vmem:[%s122_s1 + $0x68] sm:$0xff] }
   0x2   :  { %28 = vmatpush.msra.mxu0 %v27_v0  ;;  %v24_v3 = vld [vmem:[%s122_s1 + $0x60] sm:$0xff]  ;;  %v23_v4 = vld [vmem:[%s122_s1 + $0x58] sm:$0xff]  ;;  %v22_v5 = vld [vmem:[%s122_s1 + $0x50] sm:$0xff] }
   0x3   :  { %v21_v6 = vld [vmem:[%s122_s1 + $0x48] sm:$0xff]  ;;  %v20_v7 = vld [vmem:[%s122_s1 + $0x40] sm:$0xff]  ;;  %v19_v8 = vld [vmem:[%s122_s1 + $0x38] sm:$0xff] }
   0x4   :  { %29 = vmatpush.msra.mxu0 %v26_v1  ;;  %v18_v9 = vld [vmem:[%s122_s1 + $0x30] sm:$0xff]  ;;  %v17_v10 = vld [vmem:[%s122_s1 + $0x28] sm:$0xff]  ;;  %v16_v11 = vld [vmem:[%s122_s1 + $0x20] sm:$0xff] }
   0x5   :  { %v15_v12 = vld [vmem:[%s122_s1 + $0x18] sm:$0xff]  ;;  %v14_v13 = vld [vmem:[%s122_s1 + $0x10] sm:$0xff]  ;;  %v13_v14 = vld [vmem:[%s122_s1 + $0x8] sm:$0xff] }
   0x6   :  { %30 = vmatpush.msra.mxu0 %v25_v2  ;;  %v12_v15 = vld [vmem:[%s122_s1] sm:$0xff] }
   0x7   :  { %v11_v16 = vld [vmem:[%s123_s0] sm:$0xff] }
   0x8   :  { %31 = vmatpush.msra.mxu0 %v24_v3 }
   0xa   :  { %32 = vmatpush.msra.mxu0 %v23_v4 }
   0xc   :  { %33 = vmatpush.msra.mxu0 %v22_v5 }
   0xe   :  { %34 = vmatpush.msra.mxu0 %v21_v6 }
  0x10   :  { %35 = vmatpush.msra.mxu0 %v20_v7 }
  0x12   :  { %36 = vmatpush.msra.mxu0 %v19_v8 }
  0x14   :  { %37 = vmatpush.msra.mxu0 %v18_v9 }
  0x16   :  { %38 = vmatpush.msra.mxu0 %v17_v10 }
  0x18   :  { %39 = vmatpush.msra.mxu0 %v16_v11 }
  0x1a   :  { %40 = vmatpush.msra.mxu0 %v15_v12 }
  0x1c   :  { %41 = vmatpush.msra.mxu0 %v14_v13 }
  0x1e   :  { %42 = vmatpush.msra.mxu0 %v13_v14 }
  0x20   :  { %43 = vmatpush.msra.mxu0 %v12_v15 }
  0x21   :  { %44 = vmatmul.f32.vlgmr.msra.gmra.mxu0 %v11_v16 }
  0x9e   :  { %v45_v17 = vpop.f32.mrf.mxu0 }
  0x9f   :  { %48 = vst [vmem:[%s124_s2] sm:$0xff] %v45_v17 }

</bundles_post_ra>
